<compile_context>
chip_gen: v5e
topology: v5e:2x2
jax: 0.10.0
libtpu: 0.0.40
codegen_flags: <defaults>
</compile_context>

<pallas_src>
import math

import jax
import jax.numpy as jnp
from jax import lax
from jax.experimental import pallas as pl
from jax.experimental.pallas import tpu as pltpu


# ----------------------------------------------------------------------------
# Buffer setup (plain JAX) -- sinusoidal table exactly as the torch __init__.
# ----------------------------------------------------------------------------
def make_pe_table(d_model: int, max_len: int = 5000) -> jnp.ndarray:
    position = jnp.arange(max_len, dtype=jnp.float32)[:, None]            # (max_len, 1)
    div_term = jnp.exp(
        jnp.arange(0, d_model, 2, dtype=jnp.float32)
        * (-(math.log(10000.0) / d_model))
    )                                                                     # (d_model//2,)
    pe = jnp.zeros((max_len, d_model), dtype=jnp.float32)
    pe = pe.at[:, 0::2].set(jnp.sin(position * div_term))
    pe = pe.at[:, 1::2].set(jnp.cos(position * div_term))
    return pe[:, None, :]                                                 # (max_len, 1, d_model)


# ----------------------------------------------------------------------------
# Pallas kernels.
# x/out blocks are (tS, B*D) lane-dense slabs; pe block is (tS, D).  pe is NOT
# pre-broadcast in HBM -- the batch broadcast happens in-kernel (one lane-dim
# concatenate per tile), so pe HBM traffic stays B-times smaller.
# ----------------------------------------------------------------------------
def _broadcast_pe(pe, batch):
    # (tS, D) -> (tS, B*D); concatenate lowers cleanly on Mosaic.
    return pe if batch == 1 else jnp.concatenate([pe] * batch, axis=1)


def _make_pe_add_kernel(batch: int, d_model: int):
    # Per-batch aligned stores only when each batch slice is lane-aligned and
    # the unroll stays tiny; otherwise one unmasked full-slab store.
    use_batch_loop = (d_model % 128 == 0) and (batch <= 8)

    def kernel(x_ref, pe_ref, o_ref):
        pe = pe_ref[...]                                    # (tS, D), loaded once
        if use_batch_loop:
            for b in range(batch):                          # static unroll
                sl = pl.ds(b * d_model, d_model)
                o_ref[:, sl] = (x_ref[:, sl] + pe).astype(o_ref.dtype)
        else:
            pe_slab = _broadcast_pe(pe, batch)              # (tS, B*D)
            o_ref[...] = (x_ref[...] + pe_slab).astype(o_ref.dtype)

    return kernel


def _make_pe_dropout_kernel(batch: int, d_model: int, p: float, t_rows: int):
    # All closure constants are Python scalars -> jaxpr literals.
    keep_scale = float(1.0 / (1.0 - p))
    # 31-bit threshold: keep iff (hash & 0x7FFFFFFF) >= threshold  => P(keep)=1-p
    threshold = min(int(round(p * 2147483648.0)), 2147483647)

    # murmur3-style finalizer constants as int32 literals
    C1 = -1640531527   # 0x9E3779B9
    C2 = -2048144789   # 0x85EBCA6B
    C3 = -1028477387   # 0xC2B2AE35

    def kernel(seed_ref, x_ref, pe_ref, o_ref):
        ts, bd = x_ref.shape
        pe_slab = _broadcast_pe(pe_ref[...], batch)         # (tS, B*D)
        y = x_ref[...] + pe_slab

        # Stateless counter-based PRNG: hash(seed, global_row, col).  Portable
        # (no pltpu.prng_* primitives, which have no interpret-mode lowering)
        # and gives an independent mask per tile since rows are global indices.
        rows = (lax.broadcasted_iota(jnp.int32, (ts, bd), 0)
                + pl.program_id(0) * t_rows)
        cols = lax.broadcasted_iota(jnp.int32, (ts, bd), 1)
        base = seed_ref[0] ^ jnp.int32(-1150833019)         # avoid all-zero fixed point
        h = base + rows * jnp.int32(C1)
        h = (h ^ cols) * jnp.int32(C2)
        h = h ^ lax.shift_right_logical(h, 16)
        h = h * jnp.int32(C3)
        h = h ^ lax.shift_right_logical(h, 13)
        h = h * jnp.int32(C2)
        h = h ^ lax.shift_right_logical(h, 16)
        u31 = h & jnp.int32(0x7FFFFFFF)
        keep = u31 >= jnp.int32(threshold)

        o_ref[...] = jnp.where(keep, y * keep_scale, 0.0).astype(o_ref.dtype)

    return kernel


# ----------------------------------------------------------------------------
# Wrapper
# ----------------------------------------------------------------------------
def positional_encoding(x, pe_table, *, p: float = 0.1,
                        deterministic: bool = True, seed: int = 0):
    """Forward of PositionalEncoding: dropout(x + pe[:S]) on x of shape (S, B, D)."""
    S, B, D = x.shape
    max_len = pe_table.shape[0]
    assert S <= max_len, "sequence longer than the positional-encoding table"

    # torch Dropout(p=1) zeroes everything; avoid the 1/(1-p) divide-by-zero.
    if (not deterministic) and p >= 1.0:
        return jnp.zeros_like(x)

    # Free reshapes (contiguous, row-major): lane-dense 2-D views.
    # NOTE: if B*D < 128 every store is a masked partial store; realistic
    # transformer shapes (B*D in the hundreds/thousands) are fine.
    x2 = x.reshape(S, B * D)
    pe2 = pe_table.reshape(max_len, D).astype(x.dtype)   # ship pe in x.dtype

    # Row tile: multiple of 8 sublanes, ~4 MiB per x/out block (HBM-streaming
    # kernel; bigger tiles amortize the ~0.35 us per-grid-step overhead).
    row_bytes = B * D * x.dtype.itemsize
    s_pad = ((S + 7) // 8) * 8
    t_rows = max(8, ((4 << 20) // max(row_bytes, 1)) // 8 * 8)
    t_rows = min(t_rows, s_pad)
    # Keep at least 2 tiles when possible so both v7x TensorCores get work.
    if t_rows >= s_pad and s_pad > 8:
        t_rows = ((s_pad // 2 + 7) // 8) * 8
    grid = (pl.cdiv(S, t_rows),)

    # VMEM budget: double-buffered x/out/pe blocks + headroom for in-kernel
    # temporaries (pe slab, mask).  Cap at 48 MiB so it also fits v7x (64 MiB).
    block_bytes = t_rows * row_bytes
    pe_bytes = t_rows * D * pe2.dtype.itemsize
    vmem_need = 2 * (2 * block_bytes + pe_bytes)
    vmem_limit = int(min(48 << 20, max(32 << 20, 2 * vmem_need)))

    # index_maps take (grid_idx, *scalar_prefetch_refs); *_ absorbs the seed ref.
    x_spec = pl.BlockSpec((t_rows, B * D), lambda i, *_: (i, 0))
    pe_spec = pl.BlockSpec((t_rows, D), lambda i, *_: (i, 0))
    o_spec = pl.BlockSpec((t_rows, B * D), lambda i, *_: (i, 0))
    out_shape = jax.ShapeDtypeStruct((S, B * D), x.dtype)
    cparams = pltpu.CompilerParams(
        dimension_semantics=("parallel",),           # megacore sharding of the S tiles
        vmem_limit_bytes=vmem_limit,
    )

    if deterministic or p <= 0.0:
        out2 = pl.pallas_call(
            _make_pe_add_kernel(B, D),
            out_shape=out_shape,
            grid_spec=pltpu.PrefetchScalarGridSpec(
                num_scalar_prefetch=0,
                grid=grid,
                in_specs=[x_spec, pe_spec],
                out_specs=o_spec,
            ),
            compiler_params=cparams,
        )(x2, pe2)
    else:
        # TODO(synk): dropout mask cannot bit-match torch's RNG stream; a
        # stateless hash PRNG is used instead of torch's generator.
        seed_arr = jnp.asarray([seed], dtype=jnp.int32)
        out2 = pl.pallas_call(
            _make_pe_dropout_kernel(B, D, p, t_rows),
            out_shape=out_shape,
            grid_spec=pltpu.PrefetchScalarGridSpec(
                num_scalar_prefetch=1,               # seed lands in SMEM
                grid=grid,
                in_specs=[x_spec, pe_spec],
                out_specs=o_spec,
            ),
            compiler_params=cparams,
        )(seed_arr, x2, pe2)

    return out2.reshape(S, B, D)


# ----------------------------------------------------------------------------
# Demo / smoke test
# ----------------------------------------------------------------------------
if __name__ == "__main__":
    S, B, D = 8, 4, 32          # seq=8, batch=4, d_model=32  (B*D = 128, lane-dense)
    key = jax.random.PRNGKey(0)
    x = jax.random.normal(key, (S, B, D), dtype=jnp.float32)

    pe_table = make_pe_table(d_model=D, max_len=5000)

    # eval-mode (dropout == identity): verify against a pure-JAX reference
    out_eval = jax.block_until_ready(
        positional_encoding(x, pe_table, p=0.1, deterministic=True))
    ref_eval = x + pe_table[:S]
    assert out_eval.shape == (S, B, D)
    assert jnp.allclose(out_eval, ref_eval, atol=1e-6, rtol=1e-6)

    # training-mode (inverted dropout with in-kernel stateless hash PRNG)
    out_train = jax.block_until_ready(
        positional_encoding(x, pe_table, p=0.1, deterministic=False, seed=0))
    assert out_train.shape == (S, B, D)
    # every surviving element equals ref * 1/(1-p); dropped elements are 0
    surv = out_train != 0.0
    assert jnp.allclose(jnp.where(surv, out_train, 0.0),
                        jnp.where(surv, ref_eval / 0.9, 0.0),
                        atol=1e-5, rtol=1e-5)
    assert bool(jnp.any(surv))          # something kept
    assert bool(jnp.any(~surv))         # something dropped

    print("KERNEL_OK")
</pallas_src>

<mosaic_0001>
module attributes {stable_mosaic.version = 11 : i64} {
  func.func @kernel(%arg0: i32, %arg1: memref<8x128xf32, #tpu.memory_space<vmem>>, %arg2: memref<8x32xf32, #tpu.memory_space<vmem>>, %arg3: memref<8x128xf32, #tpu.memory_space<vmem>>) attributes {dimension_semantics = [#tpu.dimension_semantics<parallel>], iteration_bounds = array<i64: 1>, scalar_prefetch = 0 : i64, scratch_operands = 0 : i64, tpu.core_type = #tpu.core_type<tc>, window_params = [{transform_indices = @transform_0, window_bounds = array<i64: 8, 128>}, {transform_indices = @transform_1, window_bounds = array<i64: 8, 32>}, {transform_indices = @transform_2, window_bounds = array<i64: 8, 128>}]} {
    %c0 = arith.constant 0 : index
    %c0_0 = arith.constant 0 : index
    %0 = vector.load %arg2[%c0, %c0_0] : memref<8x32xf32, #tpu.memory_space<vmem>>, vector<8x32xf32>
    %1 = tpu.concatenate %0, %0, %0, %0 in 1 : vector<8x32xf32>, vector<8x32xf32>, vector<8x32xf32>, vector<8x32xf32> -> vector<8x128xf32>
    %c0_1 = arith.constant 0 : index
    %c0_2 = arith.constant 0 : index
    %2 = vector.load %arg1[%c0_1, %c0_2] : memref<8x128xf32, #tpu.memory_space<vmem>>, vector<8x128xf32>
    %3 = arith.addf %2, %1 : vector<8x128xf32>
    %c0_3 = arith.constant 0 : index
    %c0_4 = arith.constant 0 : index
    %4 = vector.load %arg3[%c0_3, %c0_4] : memref<8x128xf32, #tpu.memory_space<vmem>>, vector<8x128xf32>
    tpu.vector_store %arg3[%c0_3, %c0_4], %3 {strides = array<i32>} : memref<8x128xf32, #tpu.memory_space<vmem>>, vector<8x128xf32>,
    return
  }
  func.func @transform_0(%arg0: i32) -> (i32, i32) {
    %c0_i32 = arith.constant 0 : i32
    %c0_i32_0 = arith.constant 0 : i32
    return %arg0, %c0_i32 : i32, i32
  }
  func.func @transform_1(%arg0: i32) -> (i32, i32) {
    %c0_i32 = arith.constant 0 : i32
    %c0_i32_0 = arith.constant 0 : i32
    return %arg0, %c0_i32 : i32, i32
  }
  func.func @transform_2(%arg0: i32) -> (i32, i32) {
    %c0_i32 = arith.constant 0 : i32
    %c0_i32_0 = arith.constant 0 : i32
    return %arg0, %c0_i32 : i32, i32
  }
}

</mosaic_0001>

<bundles_post_ra>
// kernel: tpu_custom_call.1
= control target key start
LH: loop header
LB: loop body
LE: loop exit
PB: predicated region body
PF: predicated region fallthrough
CT: control target
= control target key end

     0   :  { %s106_s0 = inlined_call_operand.vmem [shape: f32[8,128], index: 0, kind: input, shape index: {}]   ;;  %s107_s1 = inlined_call_operand.vmem [shape: f32[5000,32], index: 1, kind: input, shape index: {}]   ;;  %s108_s2 = inlined_call_operand.hbm [shape: f32[8,128], index: 2, kind: output, shape index: {}]  }
   0x1   :  { %v12_v0 = vld [vmem:[%s107_s1] sm:$0xff] }
   0x2   :  { %7 = vsyncpa [#allocation3], 0  ;;  %s78_s11 = smov 32   ;;  %s79_s12 = smov 96   ;;  %vm23_vm0 = vcmask 261120   ;;  %vm25_vm1 = vcmask 523264  }
   0x3   :  { %14 = vrot.lane.b32.xlu0 %v12_v0, %s78_s11  ;;  %20 = vrot.lane.b32.xlu1 %v12_v0, %s79_s12  ;;  %s80_s13 = smov 64   ;;  %vm27_vm2 = vcmask 785408   ;;  %v29_v5 = vld [vmem:[%s106_s0] sm:$0xff]  ;;  %s81_s16 = smov [#allocation2]  }
   0x4   :  { %s37_s1 = sshll.u32 %s81_s16, 4  ;;  %s39_s19 = sshll.u32 %s108_s2, 4  ;;  %s38_s1 = int_to_ptr.vmem [resolvable:$true] %s37_s1  ;;  %s40_s19 = int_to_ptr.hbm [resolvable:$true] %s39_s19 }
   0xb   :  { %17 = vrot.lane.b32.xlu0 %v12_v0, %s80_s13 }
  0x75   :  { %v15_v1 = vpop.permute.xlu0 %14  ;;  %v21_v2 = vpop.permute.xlu1 %20 }
  0x76   :  { %v24_v3 = vsel %vm23_vm0, %v12_v0, %v15_v1 }
  0x7d   :  { %v18_v4 = vpop.permute.xlu0 %17 }
  0x7e   :  { %v26_v6 = vsel %vm25_vm1, %v24_v3, %v18_v4 }
  0x7f   :  { %v28_v7 = vsel %vm27_vm2, %v26_v6, %v21_v2 }
  0x80   :  { %v30_v8 = vadd.f32 %v29_v5, %v28_v7 }
  0x82   :  { %31 = vst [vmem:[#allocation2] sm:$0xff] %v30_v8 }
  0x83   :  { %42 = dma.vmem_to_hbm [thread:$0]  %s38_s1, 128, %s40_s19, [#allocation3]  }
  0x84   :  { %76 = dma.done.wait [#allocation3], 128  }
  0x85   :  { %77 = vsyncadd [#allocation3], 4294967168 }
  0x86   :  { %47 = vsyncpa [#allocation3], 1 }

</bundles_post_ra>
